<compile_context>
chip_gen: v5e
topology: v5e:2x2
jax: 0.10.0
libtpu: 0.0.40
codegen_flags: <defaults>
</compile_context>

<pallas_src>
import functools

import jax
import jax.numpy as jnp
from jax import lax
from jax.experimental import pallas as pl
from jax.experimental.pallas import tpu as pltpu


def _round_up(x, m):
    return (x + m - 1) // m * m


# ---------------------------------------------------------------------------
# Pass 1: routing.  Grid over token tiles ("parallel"); computes logits ->
# softmax -> top-1 expert / selected prob per token, and emits per-tile z-loss
# and per-expert prob-sum partials (reduced in the wrapper).
# ---------------------------------------------------------------------------
def _routing_kernel(x_ref, w_ref,
                    probs_ref, eid_ref, sel_ref, zpart_ref, ppart_ref,
                    *, tile, num_tokens, num_experts, e_pad):
    i = pl.program_id(0)

    x = x_ref[...]                                    # (tile, H), native dtype
    w = w_ref[...]                                    # (e_pad, H), zero-padded
    # router_logits = x @ W^T  (nn.Linear, bias=False), f32 accumulation.
    logits = lax.dot_general(x, w, (((1,), (1,)), ((), ())),
                             preferred_element_type=jnp.float32)  # (tile, e_pad)

    lane = lax.broadcasted_iota(jnp.int32, (tile, e_pad), 1)
    # padding experts (zero rows of W) are masked to -inf -> exp() == 0, so the
    # softmax / lse over e_pad lanes equals the E-lane result exactly.
    logits = jnp.where(lane < num_experts, logits, -jnp.inf)

    m = jnp.max(logits, axis=-1, keepdims=True)
    ex = jnp.exp(logits - m)
    se = jnp.sum(ex, axis=-1, keepdims=True)
    probs = ex / se                                   # (tile, e_pad), pads == 0
    lse = m + jnp.log(se)                             # (tile, 1)

    # validity mask for (possibly padded) token rows
    row = i * tile + lax.broadcasted_iota(jnp.int32, (tile, 1), 0)
    valid = row < num_tokens                          # (tile, 1) bool

    # top-1 expert index: first index attaining the max (torch.argmax)
    maxp = jnp.max(probs, axis=-1, keepdims=True)
    eidx = jnp.min(jnp.where(probs >= maxp, lane, e_pad),
                   axis=-1, keepdims=True)            # (tile, 1) int32

    probs_out = jnp.where(valid, probs, jnp.float32(0.0))
    probs_ref[...] = probs_out                        # lane-dense (tile, e_pad)
    # padded rows get the sentinel expert id == e_pad so they never compete for
    # capacity and produce an all-zero dispatch row in pass 2.
    eid_ref[...] = jnp.where(valid, eidx, e_pad)
    sel_ref[...] = jnp.where(valid, maxp, jnp.float32(0.0))

    z_tile = jnp.sum(jnp.where(valid, jnp.square(lse), jnp.float32(0.0)),
                     axis=0, keepdims=True)           # (1, 1)
    zpart_ref[...] = z_tile.reshape(1, 1, 1)
    ppart_ref[...] = jnp.sum(probs_out, axis=0, keepdims=True).reshape(1, 1, e_pad)


# ---------------------------------------------------------------------------
# Pass 2: capacity enforcement + dispatch.  Grid over i token tiles
# ("parallel"); the j sweep is an in-kernel fori_loop over the VMEM-resident
# lane-dense sel/eid rows, so only one grid step per i tile is paid and the
# scalar metadata is DMA'd from HBM exactly once.
# ---------------------------------------------------------------------------
def _capacity_kernel(selc_ref, eidc_ref, selr_ref, eidr_ref,
                     disp_ref, usage_ref,
                     *, tile, n_row_tiles, e_pad, capacity):
    i = pl.program_id(0)

    p_i = selc_ref[...]                               # (tile, 1) f32
    e_i = eidc_ref[...]                               # (tile, 1) int32

    # Tie-break trim: the "earlier token" predicate is constant per (i, j) tile
    # except on the diagonal; a hoisted strict-lower-triangular mask replaces
    # the per-step global-index iota construction.
    li = lax.broadcasted_iota(jnp.int32, (tile, tile), 0)
    lj = lax.broadcasted_iota(jnp.int32, (tile, tile), 1)
    tri = lj < li                                     # (tile, tile) bool

    def body(j, rank):
        p_j = selr_ref[j]                             # (1, tile) f32
        e_j = eidr_ref[j]                             # (1, tile) int32
        same = e_i == e_j                             # (tile, tile)
        earlier = jnp.logical_or(j < i, jnp.logical_and(j == i, tri))
        beats = jnp.logical_or(p_j > p_i,
                               jnp.logical_and(p_j == p_i, earlier))
        hits = jnp.logical_and(same, beats)
        # int32 rank -> exact counts regardless of N (review correctness note)
        return rank + jnp.sum(hits.astype(jnp.int32), axis=1, keepdims=True)

    rank = lax.fori_loop(0, n_row_tiles, body,
                         jnp.zeros((tile, 1), jnp.int32))

    keep = rank < capacity                            # (tile, 1) bool
    lane = lax.broadcasted_iota(jnp.int32, (tile, e_pad), 1)
    onehot = lane == e_i                              # padded rows -> all False
    dispatch = jnp.where(jnp.logical_and(keep, onehot),
                         jnp.float32(1.0), jnp.float32(0.0))
    disp_ref[...] = dispatch                          # lane-dense (tile, e_pad)
    # per-tile usage partial (exact in f32 per tile; wrapper sums across tiles)
    usage_ref[...] = jnp.sum(dispatch, axis=0, keepdims=True).reshape(1, 1, e_pad)


def switch_router_forward(x, router_weight, capacity_factor=1.1,
                          z_loss_coef=0.001, token_tile=None):
    """x: (B, S, H); router_weight: (E, H) (torch nn.Linear convention)."""
    B, S, H = x.shape
    E = router_weight.shape[0]
    N = B * S
    capacity = int(N * capacity_factor / E)   # torch int() == floor for positives
    e_pad = _round_up(max(E, 128), 128)       # lane-dense expert dim

    # Per-core VMEM capacity (64 MiB on v7x, 128 MiB on v5e/v6e); keep headroom
    # for compiler internal scratch and the pipeline double-buffers.
    try:
        vmem_cap = int(pltpu.get_tpu_info().vmem_capacity_bytes)
    except Exception:
        vmem_cap = 64 * 1024 * 1024           # conservative fallback
    vmem_budget = int(vmem_cap * 0.6)
    vmem_limit = int(vmem_cap * 0.75)

    x2d = x.reshape(N, H)
    # NOTE(review): W is cast to the activation dtype; callers that pass bf16
    # activations get the near-linear HBM-bandwidth win on the logits pass.
    w = jnp.pad(router_weight.astype(x2d.dtype), ((0, e_pad - E), (0, 0)))
    itemsize = x2d.dtype.itemsize

    # Token tile: multiple of 8 (sublanes), largest candidate that fits the
    # VMEM budget (x double-buffer + W + probs out + pass-2 temporaries).
    max_tile = _round_up(N, 8)
    if token_tile is not None:
        tile = min(_round_up(max(8, int(token_tile)), 8), max_tile)
    else:
        tile = min(8, max_tile)
        for cand in (512, 256, 128, 64, 32, 16, 8):
            if cand > max_tile:
                continue
            need = (2 * cand * H * itemsize        # x double buffer
                    + 2 * e_pad * H * itemsize     # router weight buffers
                    + 2 * cand * e_pad * 4         # probs/dispatch out buffers
                    + 12 * cand * cand             # pass-2 (tile,tile) temps
                    + (2 << 20))                   # misc outputs / headroom
            if need <= vmem_budget:
                tile = cand
                break
    n_pad = _round_up(N, tile)
    n_tiles = n_pad // tile

    if n_pad != N:
        x2d = jnp.pad(x2d, ((0, n_pad - N), (0, 0)))

    # ---------------- pass 1 ----------------
    kernel1 = functools.partial(_routing_kernel, tile=tile, num_tokens=N,
                                num_experts=E, e_pad=e_pad)
    probs_p, eid, sel, zpart, ppart = pl.pallas_call(
        kernel1,
        out_shape=(
            jax.ShapeDtypeStruct((n_pad, e_pad), jnp.float32),      # probs
            jax.ShapeDtypeStruct((n_pad, 1), jnp.int32),            # top-1 expert
            jax.ShapeDtypeStruct((n_pad, 1), jnp.float32),          # selected prob
            jax.ShapeDtypeStruct((n_tiles, 1, 1), jnp.float32),     # z partials
            jax.ShapeDtypeStruct((n_tiles, 1, e_pad), jnp.float32), # prob-sum partials
        ),
        grid=(n_tiles,),
        in_specs=[
            pl.BlockSpec((tile, H), lambda i: (i, 0)),
            pl.BlockSpec((e_pad, H), lambda i: (0, 0)),
        ],
        out_specs=(
            pl.BlockSpec((tile, e_pad), lambda i: (i, 0)),
            pl.BlockSpec((tile, 1), lambda i: (i, 0)),
            pl.BlockSpec((tile, 1), lambda i: (i, 0)),
            pl.BlockSpec((1, 1, 1), lambda i: (i, 0, 0)),
            pl.BlockSpec((1, 1, e_pad), lambda i: (i, 0, 0)),
        ),
        compiler_params=pltpu.CompilerParams(
            dimension_semantics=("parallel",),
            vmem_limit_bytes=vmem_limit),
        cost_estimate=pl.CostEstimate(
            flops=2 * n_pad * H * e_pad,
            transcendentals=n_pad * (e_pad + 1),
            bytes_accessed=(n_pad * H + e_pad * H) * itemsize
                           + n_pad * (e_pad + 2) * 4),
    )(x2d, w)

    # ---------------- pass 2 ----------------
    # Lane-dense row views of the per-token scalars for the j-sweep: a cheap
    # wrapper-side reshape (8 B/token HBM copy) instead of an in-kernel thin
    # transpose; the rows are then VMEM-resident across all i grid steps.
    sel_row = sel.reshape(n_tiles, 1, tile)
    eid_row = eid.reshape(n_tiles, 1, tile)

    kernel2 = functools.partial(_capacity_kernel, tile=tile,
                                n_row_tiles=n_tiles, e_pad=e_pad,
                                capacity=capacity)
    disp_p, usage_part = pl.pallas_call(
        kernel2,
        out_shape=(
            jax.ShapeDtypeStruct((n_pad, e_pad), jnp.float32),      # dispatch
            jax.ShapeDtypeStruct((n_tiles, 1, e_pad), jnp.float32), # usage partials
        ),
        grid=(n_tiles,),
        in_specs=[
            pl.BlockSpec((tile, 1), lambda i: (i, 0)),
            pl.BlockSpec((tile, 1), lambda i: (i, 0)),
            pl.BlockSpec((n_tiles, 1, tile), lambda i: (0, 0, 0)),  # resident rows
            pl.BlockSpec((n_tiles, 1, tile), lambda i: (0, 0, 0)),  # resident rows
        ],
        out_specs=(
            pl.BlockSpec((tile, e_pad), lambda i: (i, 0)),
            pl.BlockSpec((1, 1, e_pad), lambda i: (i, 0, 0)),
        ),
        compiler_params=pltpu.CompilerParams(
            dimension_semantics=("parallel",),
            vmem_limit_bytes=vmem_limit),
        cost_estimate=pl.CostEstimate(
            flops=6 * n_pad * n_pad,
            transcendentals=0,
            bytes_accessed=n_pad * 16 + n_pad * e_pad * 4),
    )(sel, eid, sel_row, eid_row)

    # Final scalar reductions / aux loss in the wrapper (tiny; keeps both
    # kernels free of cross-tile state so "parallel" semantics are correct).
    inv_n = jnp.float32(1.0 / N)
    zsum = jnp.sum(zpart)
    psum = jnp.sum(ppart[:, 0, :E], axis=0)
    usage = jnp.sum(usage_part[:, 0, :E], axis=0)
    load_balancing = jnp.sum((psum * inv_n) * (usage * inv_n)) * jnp.float32(E)
    aux_loss = load_balancing + jnp.float32(z_loss_coef) * zsum * inv_n

    probs = probs_p[:N, :E].reshape(B, S, E)
    dispatch = disp_p[:N, :E].reshape(B, S, E)
    # the reference writes 1.0 into both dispatch and combine -> identical;
    # the duplicate HBM output stream is eliminated and returned twice here.
    return dispatch, dispatch, probs, aux_loss


# Pure-JAX reference of the eval-mode forward (for correctness checking only).
def _reference_forward(x, router_weight, capacity_factor=1.1, z_loss_coef=0.001):
    B, S, H = x.shape
    E = router_weight.shape[0]
    N = B * S
    logits = jnp.einsum("bsh,eh->bse", x.astype(jnp.float32),
                        router_weight.astype(jnp.float32))
    lse = jax.scipy.special.logsumexp(logits, axis=-1)
    z_loss = z_loss_coef * jnp.mean(jnp.square(lse))
    probs = jax.nn.softmax(logits, axis=-1)
    p2 = probs.reshape(N, E)
    eidx = jnp.argmax(p2, axis=-1)
    selp = jnp.max(p2, axis=-1)
    capacity = int(N * capacity_factor / E)
    tok = jnp.arange(N)
    same = eidx[:, None] == eidx[None, :]
    beats = (selp[None, :] > selp[:, None]) | (
        (selp[None, :] == selp[:, None]) & (tok[None, :] < tok[:, None]))
    rank = jnp.sum(same & beats, axis=1)
    keep = rank < capacity
    dispatch = jnp.where(keep[:, None],
                         jax.nn.one_hot(eidx, E, dtype=jnp.float32), 0.0)
    rppe = p2.sum(axis=0) / N
    usage = dispatch.sum(axis=0) / N
    aux = jnp.sum(rppe * usage) * E + z_loss
    return dispatch.reshape(B, S, E), probs, aux


if __name__ == "__main__":
    key = jax.random.PRNGKey(0)
    kx, kw = jax.random.split(key)

    B, S, H, E = 2, 8, 32, 4
    x = jax.random.normal(kx, (B, S, H), dtype=jnp.float32)
    # NOTE: the PyTorch module zero-inits the router weight (all tokens would
    # pick expert 0); a small random weight makes the routing path non-trivial.
    router_weight = 0.02 * jax.random.normal(kw, (E, H), dtype=jnp.float32)

    # token_tile=8 -> 2 token tiles, so the multi-tile paths (per-tile partials,
    # the in-kernel j sweep, diagonal tie-break) are exercised at this toy size.
    dispatch, combine, probs, aux_loss = switch_router_forward(
        x, router_weight, token_tile=8)
    jax.block_until_ready((dispatch, combine, probs, aux_loss))

    # correctness + sanity checks against the pure-JAX eval-mode reference
    ref_dispatch, ref_probs, ref_aux = _reference_forward(x, router_weight)
    capacity = int(B * S * 1.1 / E)
    per_expert = jnp.sum(dispatch.reshape(-1, E), axis=0)
    assert dispatch.shape == (B, S, E) and combine.shape == (B, S, E)
    assert probs.shape == (B, S, E)
    assert float(jnp.max(per_expert)) <= capacity
    assert bool(jnp.allclose(jnp.sum(probs, axis=-1), 1.0, atol=1e-5))
    assert bool(jnp.all(dispatch == combine))
    assert bool(jnp.allclose(probs, ref_probs, atol=1e-5))
    assert bool(jnp.array_equal(dispatch, ref_dispatch))
    assert bool(jnp.allclose(aux_loss, ref_aux, atol=1e-5, rtol=1e-5))
    assert bool(jnp.isfinite(aux_loss))

    print("KERNEL_OK")
</pallas_src>

<mosaic_0001>
module attributes {stable_mosaic.version = 11 : i64} {
  func.func @_routing_kernel(%arg0: i32, %arg1: memref<8x32xf32, #tpu.memory_space<vmem>>, %arg2: memref<128x32xf32, #tpu.memory_space<vmem>>, %arg3: memref<8x128xf32, #tpu.memory_space<vmem>>, %arg4: memref<8x1xi32, #tpu.memory_space<vmem>>, %arg5: memref<8x1xf32, #tpu.memory_space<vmem>>, %arg6: memref<1x1x1xf32, #tpu.memory_space<vmem>>, %arg7: memref<1x1x128xf32, #tpu.memory_space<vmem>>) attributes {dimension_semantics = [#tpu.dimension_semantics<parallel>], iteration_bounds = array<i64: 2>, scalar_prefetch = 0 : i64, scratch_operands = 0 : i64, tpu.core_type = #tpu.core_type<tc>, window_params = [{transform_indices = @transform_0, window_bounds = array<i64: 8, 32>}, {pipeline_mode = #tpu.pipeline_mode<synchronous>, transform_indices = @transform_1, window_bounds = array<i64: 128, 32>}, {transform_indices = @transform_2, window_bounds = array<i64: 8, 128>}, {transform_indices = @transform_3, window_bounds = array<i64: 8, 1>}, {transform_indices = @transform_4, window_bounds = array<i64: 8, 1>}, {transform_indices = @transform_5, window_bounds = array<i64: 1, 1, 1>}, {transform_indices = @transform_6, window_bounds = array<i64: 1, 1, 128>}]} {
    %c0 = arith.constant 0 : index
    %c0_0 = arith.constant 0 : index
    %0 = vector.load %arg1[%c0, %c0_0] : memref<8x32xf32, #tpu.memory_space<vmem>>, vector<8x32xf32>
    %c0_1 = arith.constant 0 : index
    %c0_2 = arith.constant 0 : index
    %1 = vector.load %arg2[%c0_1, %c0_2] : memref<128x32xf32, #tpu.memory_space<vmem>>, vector<128x32xf32>
    %cst = arith.constant dense<0.000000e+00> : vector<8x128xf32>
    %2 = tpu.matmul %0, %1, %cst {dimension_numbers = #tpu.dot_dimension_numbers<[1], [1], [0], [0], [0, 0, 1, 0], [], []>} : vector<8x32xf32>, vector<128x32xf32>, vector<8x128xf32> -> vector<8x128xf32>
    %3 = tpu.iota {dimensions = array<i32: 1>} : vector<8x128xi32>
    %c4_i32 = arith.constant 4 : i32
    %4 = vector.broadcast %c4_i32 : i32 to vector<8x128xi32>
    %5 = arith.cmpi slt, %3, %4 : vector<8x128xi32>
    %cst_3 = arith.constant 0xFF800000 : f32
    %6 = vector.broadcast %cst_3 : f32 to vector<8x128xf32>
    %7 = arith.select %5, %2, %6 : vector<8x128xi1>, vector<8x128xf32>
    %cst_4 = arith.constant dense<0xFF800000> : vector<8xf32>
    %8 = vector.multi_reduction <maximumf>, %7, %cst_4 [1] : vector<8x128xf32> to vector<8xf32>
    %9 = vector.shape_cast %8 : vector<8xf32> to vector<8x1xf32>
    %10 = vector.broadcast %9 : vector<8x1xf32> to vector<8x128xf32>
    %11 = arith.subf %7, %10 : vector<8x128xf32>
    %12 = math.exp %11 : vector<8x128xf32>
    %cst_5 = arith.constant dense<0.000000e+00> : vector<8xf32>
    %13 = vector.multi_reduction <add>, %12, %cst_5 [1] : vector<8x128xf32> to vector<8xf32>
    %14 = vector.shape_cast %13 : vector<8xf32> to vector<8x1xf32>
    %15 = vector.broadcast %14 : vector<8x1xf32> to vector<8x128xf32>
    %16 = arith.divf %12, %15 : vector<8x128xf32>
    %17 = math.log %14 : vector<8x1xf32>
    %18 = arith.addf %9, %17 : vector<8x1xf32>
    %c8_i32 = arith.constant 8 : i32
    %19 = arith.muli %arg0, %c8_i32 : i32
    %20 = tpu.iota {dimensions = array<i32: 0>} : vector<8x1xi32>
    %21 = vector.broadcast %19 : i32 to vector<8x1xi32>
    %22 = arith.addi %21, %20 : vector<8x1xi32>
    %c16_i32 = arith.constant 16 : i32
    %23 = vector.broadcast %c16_i32 : i32 to vector<8x1xi32>
    %24 = arith.cmpi slt, %22, %23 : vector<8x1xi32>
    %cst_6 = arith.constant dense<0xFF800000> : vector<8xf32>
    %25 = vector.multi_reduction <maximumf>, %16, %cst_6 [1] : vector<8x128xf32> to vector<8xf32>
    %26 = vector.shape_cast %25 : vector<8xf32> to vector<8x1xf32>
    %27 = vector.broadcast %26 : vector<8x1xf32> to vector<8x128xf32>
    %28 = arith.cmpf oge, %16, %27 : vector<8x128xf32>
    %c128_i32 = arith.constant 128 : i32
    %29 = vector.broadcast %c128_i32 : i32 to vector<8x128xi32>
    %30 = arith.select %28, %3, %29 : vector<8x128xi1>, vector<8x128xi32>
    %cst_7 = arith.constant dense<2147483647> : vector<8xi32>
    %31 = vector.multi_reduction <minsi>, %30, %cst_7 [1] : vector<8x128xi32> to vector<8xi32>
    %32 = vector.shape_cast %31 : vector<8xi32> to vector<8x1xi32>
    %cst_8 = arith.constant 0.000000e+00 : f32
    %33 = vector.shape_cast %24 : vector<8x1xi1> to vector<8x1xi1>
    %34 = vector.broadcast %33 : vector<8x1xi1> to vector<8x128xi1>
    %35 = vector.broadcast %cst_8 : f32 to vector<8x128xf32>
    %36 = arith.select %34, %16, %35 : vector<8x128xi1>, vector<8x128xf32>
    %c0_9 = arith.constant 0 : index
    %c0_10 = arith.constant 0 : index
    %37 = vector.load %arg3[%c0_9, %c0_10] : memref<8x128xf32, #tpu.memory_space<vmem>>, vector<8x128xf32>
    tpu.vector_store %arg3[%c0_9, %c0_10], %36 {strides = array<i32>} : memref<8x128xf32, #tpu.memory_space<vmem>>, vector<8x128xf32>,
    %c128_i32_11 = arith.constant 128 : i32
    %38 = vector.broadcast %c128_i32_11 : i32 to vector<8x1xi32>
    %39 = arith.select %24, %32, %38 : vector<8x1xi1>, vector<8x1xi32>
    %c0_12 = arith.constant 0 : index
    %c0_13 = arith.constant 0 : index
    %40 = vector.load %arg4[%c0_12, %c0_13] : memref<8x1xi32, #tpu.memory_space<vmem>>, vector<8x1xi32>
    tpu.vector_store %arg4[%c0_12, %c0_13], %39 {strides = array<i32>} : memref<8x1xi32, #tpu.memory_space<vmem>>, vector<8x1xi32>,
    %cst_14 = arith.constant 0.000000e+00 : f32
    %41 = vector.broadcast %cst_14 : f32 to vector<8x1xf32>
    %42 = arith.select %24, %26, %41 : vector<8x1xi1>, vector<8x1xf32>
    %c0_15 = arith.constant 0 : index
    %c0_16 = arith.constant 0 : index
    %43 = vector.load %arg5[%c0_15, %c0_16] : memref<8x1xf32, #tpu.memory_space<vmem>>, vector<8x1xf32>
    tpu.vector_store %arg5[%c0_15, %c0_16], %42 {strides = array<i32>} : memref<8x1xf32, #tpu.memory_space<vmem>>, vector<8x1xf32>,
    %44 = arith.mulf %18, %18 : vector<8x1xf32>
    %cst_17 = arith.constant 0.000000e+00 : f32
    %45 = vector.broadcast %cst_17 : f32 to vector<8x1xf32>
    %46 = arith.select %24, %44, %45 : vector<8x1xi1>, vector<8x1xf32>
    %cst_18 = arith.constant dense<0.000000e+00> : vector<1xf32>
    %47 = vector.multi_reduction <add>, %46, %cst_18 [0] : vector<8x1xf32> to vector<1xf32>
    %48 = vector.shape_cast %47 : vector<1xf32> to vector<1x1xf32>
    %49 = vector.shape_cast %48 : vector<1x1xf32> to vector<1x1x1xf32>
    %c0_19 = arith.constant 0 : index
    %c0_20 = arith.constant 0 : index
    %c0_21 = arith.constant 0 : index
    %50 = vector.load %arg6[%c0_19, %c0_20, %c0_21] : memref<1x1x1xf32, #tpu.memory_space<vmem>>, vector<1x1x1xf32>
    tpu.vector_store %arg6[%c0_19, %c0_20, %c0_21], %49 {strides = array<i32>} : memref<1x1x1xf32, #tpu.memory_space<vmem>>, vector<1x1x1xf32>,
    %cst_22 = arith.constant dense<0.000000e+00> : vector<128xf32>
    %51 = vector.multi_reduction <add>, %36, %cst_22 [0] : vector<8x128xf32> to vector<128xf32>
    %52 = vector.shape_cast %51 : vector<128xf32> to vector<1x128xf32>
    %53 = vector.shape_cast %52 : vector<1x128xf32> to vector<1x1x128xf32>
    %c0_23 = arith.constant 0 : index
    %c0_24 = arith.constant 0 : index
    %c0_25 = arith.constant 0 : index
    %54 = vector.load %arg7[%c0_23, %c0_24, %c0_25] : memref<1x1x128xf32, #tpu.memory_space<vmem>>, vector<1x1x128xf32>
    tpu.vector_store %arg7[%c0_23, %c0_24, %c0_25], %53 {strides = array<i32>} : memref<1x1x128xf32, #tpu.memory_space<vmem>>, vector<1x1x128xf32>,
    return
  }
  func.func @transform_0(%arg0: i32) -> (i32, i32) {
    %c0_i32 = arith.constant 0 : i32
    %c0_i32_0 = arith.constant 0 : i32
    return %arg0, %c0_i32 : i32, i32
  }
  func.func @transform_1(%arg0: i32) -> (i32, i32) {
    %c0_i32 = arith.constant 0 : i32
    %c0_i32_0 = arith.constant 0 : i32
    %c0_i32_1 = arith.constant 0 : i32
    return %c0_i32, %c0_i32_0 : i32, i32
  }
  func.func @transform_2(%arg0: i32) -> (i32, i32) {
    %c0_i32 = arith.constant 0 : i32
    %c0_i32_0 = arith.constant 0 : i32
    return %arg0, %c0_i32 : i32, i32
  }
  func.func @transform_3(%arg0: i32) -> (i32, i32) {
    %c0_i32 = arith.constant 0 : i32
    %c0_i32_0 = arith.constant 0 : i32
    return %arg0, %c0_i32 : i32, i32
  }
  func.func @transform_4(%arg0: i32) -> (i32, i32) {
    %c0_i32 = arith.constant 0 : i32
    %c0_i32_0 = arith.constant 0 : i32
    return %arg0, %c0_i32 : i32, i32
  }
  func.func @transform_5(%arg0: i32) -> (i32, i32, i32) {
    %c0_i32 = arith.constant 0 : i32
    %c0_i32_0 = arith.constant 0 : i32
    %c0_i32_1 = arith.constant 0 : i32
    return %arg0, %c0_i32, %c0_i32_0 : i32, i32, i32
  }
  func.func @transform_6(%arg0: i32) -> (i32, i32, i32) {
    %c0_i32 = arith.constant 0 : i32
    %c0_i32_0 = arith.constant 0 : i32
    %c0_i32_1 = arith.constant 0 : i32
    return %arg0, %c0_i32, %c0_i32_0 : i32, i32, i32
  }
}

</mosaic_0001>

<bundles_post_ra>
// kernel: tpu_custom_call.1
= control target key start
LH: loop header
LB: loop body
LE: loop exit
PB: predicated region body
PF: predicated region fallthrough
CT: control target
= control target key end

     0   :  { %s1088_s0 = inlined_call_operand.vmem [shape: f32[16,32], index: 0, kind: input, shape index: {}]   ;;  %s1089_s1 = inlined_call_operand.vmem [shape: f32[128,32], index: 1, kind: input, shape index: {}]   ;;  %s1090_s2 = inlined_call_operand.hbm [shape: f32[16,128], index: 2, kind: output, shape index: {0}]   ;;  %s1091_s3 = inlined_call_operand.vmem [shape: s32[16,1], index: 3, kind: output, shape index: {1}]   ;;  %s1092_s4 = inlined_call_operand.vmem [shape: f32[16,1], index: 4, kind: output, shape index: {2}]   ;;  %s1093_s5 = inlined_call_operand.vmem [shape: f32[2,1,1], index: 5, kind: output, shape index: {3}]   ;;  %s1094_s6 = inlined_call_operand.hbm [shape: f32[2,1,128], index: 6, kind: output, shape index: {4}]  }
   0x1   :  { %1096 = sst [smem:[#allocation8_spill]] %s1088_s0 }
   0x2   :  { %12 = vsyncpa [#allocation3], 0 }
   0x3   :  { %14 = vsyncpa [#allocation3 + $0x1], 0 }
   0x4   :  { %15 = vsyncpa [#allocation5], 0 }
   0x5   :  { %17 = vsyncpa [#allocation5 + $0x1], 0  ;;  %s871_s21 = smov 0   ;;  %s873_s22 = smov 0  }
   0x6   :  { %s875_s23 = smov 0   ;;  %s877_s24 = smov 0  }
   0x7 LB: > { %s892_s25 = sadd.s32 4294967295, %s834_s24   ;;  %s660_s26 = sadd.s32 4294967294, %s834_s24   ;;  %s834_s24 = sphi %s877_s24, %s1104_s24   ;;  %s830_s23 = sphi %s875_s23, %s1103_s23   ;;  %s826_s22 = sphi %s873_s22, %s1102_s22   ;;  %s822_s21 = sphi %s871_s21, %s1101_s21  }
   0x8   : > { %s896_s27 = sadd.s32 1, %s834_s24   ;;  %s77_s28 = sadd.s32 1, %s830_s23 }
   0x9   : > { %s74_s29 = ssub.s32 %s834_s24, %s896_s27  ;;  %p87_p0 = scmp.ne.s32.totalorder %s830_s23, %s826_s22 }
   0xa   : > { %p75_p1 = scmp.eq.s32.totalorder %s74_s29, 0  ;;  %p88_p2 = scmp.eq.s32.totalorder %s892_s25, 1 }
   0xb   : > { %p93_p3 = scmp.ne.s32.totalorder %s826_s22, %s822_s21  ;;  %p94_p4 = scmp.eq.s32.totalorder %s660_s26, 1 }
   0xc   : > { %s907_s30 = scalar_select %p75_p1, %s830_s23, %s77_s28  }
   0xd   : > { %p909_p5 = por %p88_p2, %p87_p0  ;;  %p913_p6 = por %p94_p4, %p93_p3 }
   0xe   : > { %p663_p7 = scmp.ge.s32.totalorder %s834_s24, 1  ;;  %p226_p8 = scmp.lt.s32.totalorder %s834_s24, 3 }
  0x10   : > { %p227_p9 = pnand %p663_p7, %p226_p8 }
  0x11   : > { %p270_p10 = scmp.lt.s32.totalorder (!%p227_p9), %s892_s25, 1  ;;  %s1099_s0 = sld [smem:[#allocation8_spill]] (!%p227_p9) }
  0x12   : > { %230 = sbr.rel (%p227_p9) target bundleno = 839 (0x347), region = 28  ;;  %s685_s16 = sshll.u32 (!%p227_p9), %s892_s25, 3 }
  0x13   : > { %s1005_s17 = sand.u32 (!%p227_p9), 1, %s826_s22   ;;  %s501_s26 = scalar_lea.hbm (!%p227_p9), %s1094_s6, %s892_s25 }
  0x14   : > { %s664_s18 = sshll.u32 (!%p227_p9), %s1005_s17, 3  ;;  %s1095_s9 = scalar_lea.vmem (!%p227_p9), [#allocation4], %s1005_s17 }
  0x15   : > { %s1012_s19 = scalar_lea.vmem (!%p227_p9), [#allocation2], %s664_s18  ;;  %s454_s12 = scalar_lea.sflag (!%p227_p9), [#allocation3], %s1005_s17 }
  0x17   : > { %v301_v0 = vld [vmem:[%s1089_s1 + $0x78] sm:$0xff]  ;;  %vm302_vm0 = vcmask 261120   ;;  %v300_v1 = vld [vmem:[%s1089_s1 + $0x70] sm:$0xff]  ;;  %v299_v2 = vld [vmem:[%s1089_s1 + $0x68] sm:$0xff]  ;;  %s976_s28 = scalar_select %p270_p10, %s892_s25, 1  ;;  %v374_v17 = vlaneseq  ;;  %v406_v27 = vstv %s685_s16  ;;  %vm444_vm7 = vcmask 0  }
  0x18   : > { %668 = vmatpush.xpose.msk.msra.mxu0 %vm302_vm0, %v301_v0  ;;  %v298_v3 = vld [vmem:[%s1089_s1 + $0x60] sm:$0xff]  ;;  %v297_v4 = vld [vmem:[%s1089_s1 + $0x58] sm:$0xff]  ;;  %v296_v5 = vld [vmem:[%s1089_s1 + $0x50] sm:$0xff]  ;;  %vm432_vm8 = vcmask 7168  }
  0x19   : > { %v295_v6 = vld [vmem:[%s1089_s1 + $0x48] sm:$0xff]  ;;  %v294_v7 = vld [vmem:[%s1089_s1 + $0x40] sm:$0xff]  ;;  %v293_v8 = vld [vmem:[%s1089_s1 + $0x38] sm:$0xff]  ;;  %s983_s10 = sshll.u32 %s976_s28, 3  ;;  %v995_v18 = vand.u32 127, %v374_v17  ;;  %v405_v26 = vshrl.u32 %v374_v17, 7  ;;  %s284_s29 = scalar_lea.vmem %s1093_s5, %s976_s28 }
  0x1a   : > { %v292_v9 = vld [vmem:[%s1089_s1 + $0x30] sm:$0xff]  ;;  %v291_v10 = vld [vmem:[%s1089_s1 + $0x28] sm:$0xff]  ;;  %v290_v11 = vld [vmem:[%s1089_s1 + $0x20] sm:$0xff]  ;;  %s273_s15 = scalar_lea.vmem %s1099_s0, %s983_s10  ;;  %s281_s13 = scalar_lea.vmem %s1092_s4, %s983_s10 }
  0x1b   : > { %v289_v12 = vld [vmem:[%s1089_s1 + $0x18] sm:$0xff]  ;;  %v288_v13 = vld [vmem:[%s1089_s1 + $0x10] sm:$0xff]  ;;  %v287_v14 = vld [vmem:[%s1089_s1 + $0x8] sm:$0xff]  ;;  %vm376_vm1 = vcmp.lt.s32.totalorder %v995_v18, 4  ;;  %v1001_v31 = vadd.s32 %v406_v27, %v405_v26 }
  0x1c   : > { %669 = vmatpush.xpose.msk.msra.mxu0 %vm302_vm0, %v300_v1  ;;  %v286_v15 = vld [vmem:[%s1089_s1] sm:$0xff] }
  0x1d   : > { %v285_v16 = vld [vmem:[%s273_s15] sm:$0xff]  ;;  %vm408_vm3 = vcmp.lt.s32.totalorder %v1001_v31, 16  ;;  %s479_s15 = scalar_lea.hbm %s1090_s2, %s685_s16  ;;  %s760_s16 = scalar_lea.hbm %s1090_s2, 16 }
  0x1e   : > { %s483_s11 = sshll.u32 %s479_s15, 4  ;;  %s484_s11 = int_to_ptr.hbm [resolvable:$true] %s483_s11 }
  0x20   : > { %670 = vmatpush.xpose.msk.msra.mxu0 %vm302_vm0, %v299_v2 }
  0x24   : > { %671 = vmatpush.xpose.msk.msra.mxu0 %vm302_vm0, %v298_v3 }
  0x28   : > { %672 = vmatpush.xpose.msk.msra.mxu0 %vm302_vm0, %v297_v4 }
  0x2c   : > { %673 = vmatpush.xpose.msk.msra.mxu0 %vm302_vm0, %v296_v5 }
  0x30   : > { %674 = vmatpush.xpose.msk.msra.mxu0 %vm302_vm0, %v295_v6 }
  0x34   : > { %675 = vmatpush.xpose.msk.msra.mxu0 %vm302_vm0, %v294_v7 }
  0x38   : > { %676 = vmatpush.xpose.msk.msra.mxu0 %vm302_vm0, %v293_v8 }
  0x3c   : > { %677 = vmatpush.xpose.msk.msra.mxu0 %vm302_vm0, %v292_v9 }
  0x40   : > { %678 = vmatpush.xpose.msk.msra.mxu0 %vm302_vm0, %v291_v10 }
  0x44   : > { %679 = vmatpush.xpose.msk.msra.mxu0 %vm302_vm0, %v290_v11 }
  0x48   : > { %680 = vmatpush.xpose.msk.msra.mxu0 %vm302_vm0, %v289_v12 }
  0x4c   : > { %681 = vmatpush.xpose.msk.msra.mxu0 %vm302_vm0, %v288_v13 }
  0x50   : > { %682 = vmatpush.xpose.msk.msra.mxu0 %vm302_vm0, %v287_v14 }
  0x54   : > { %683 = vmatpush.xpose.msk.msra.mxu0 %vm302_vm0, %v286_v15 }
  0x57   : > { %684 = vmatmul.msk.f32.vlgmr.msra.gmra.mxu0 %vm302_vm0, %v285_v16 }
  0xd4   : > { %v371_v19 = vpop.f32.mrf.mxu0 }
  0xd5   : > { %v377_v20 = vsel %vm376_vm1, %v371_v19, -inf }
  0xd6   : > { %378 = vmax.xlane.f32.xlu0 %v377_v20 }
 0x149   : > { %v379_v21 = vpop.xlane.xlu0 %378 }
 0x14a   : > { %v380_v22 = vsub.f32 %v377_v20, %v379_v21 }
 0x14c   : > { %v381_v23 = vmul.f32 1.442695, %v380_v22 }
 0x14e   : > { %734 = vpow2.f32 %v381_v23 }
 0x154   : > { %v735_v24 = vpop.eup %734 }
 0x155   : > { %383 = vadd.xlane.f32.xlu0 %v735_v24 }
 0x1c8   : > { %v384_v25 = vpop.xlane.xlu0 %383 }
 0x1c9   : > { %736 = vrcp.f32 %v384_v25  ;;  %v396_v34 = vand.u32 2147483648, %v384_v25  ;;  %v394_v37 = vand.u32 2147483647, %v384_v25  ;;  %vm390_vm4 = vweird.f32 %v384_v25 }
 0x1ca   : > { %738 = vlog2.f32 %v384_v25 }
 0x1cb   : > { %v397_v40 = vor.u32 1.1754944e-38, %v396_v34  ;;  %vm395_vm6 = vcmp.eq.f32.partialorder %v394_v37, 8.507059e+37 }
 0x1cf   : > { %v737_v28 = vpop.eup %736 }
 0x1d0   : > { %v739_v29 = vpop.eup %738  ;;  %v386_v30 = vmul.f32 %v737_v28, %v384_v25  ;;  %vm391_vm2 = vweird.f32 %v737_v28 }
 0x1d1   : > { %v401_v32 = vmul.f32 0.6931472, %v739_v29  ;;  %vm392_vm5 = vmor %vm390_vm4, %vm391_vm2 }
 0x1d2   : > { %v387_v33 = vsub.f32 1.0, %v386_v30 }
 0x1d3   : > { %v402_v35 = vadd.f32 %v401_v32, %v379_v21 }
 0x1d4   : > { %v388_v36 = vmul.f32 %v737_v28, %v387_v33 }
 0x1d5   : > { %v436_v38 = vmul.f32 %v402_v35, %v402_v35 }
 0x1d6   : > { %v389_v39 = vadd.f32 %v737_v28, %v388_v36 }
 0x1d7   : > { %v437_v41 = vsel %vm408_vm3, %v436_v38, 0.0 }
 0x1d8   : > { %v393_v42 = vsel %vm392_vm5, %v737_v28, %v389_v39  ;;  %v438_v43 = vrot.slane %v437_v41, 4 }
 0x1d9   : > { %v398_v44 = vsel %vm395_vm6, %v397_v40, %v393_v42 }
 0x1da   : > { %v399_v45 = vmul.f32 %v735_v24, %v398_v44  ;;  %v439_v46 = vadd.f32 %v438_v43, %v437_v41 }
 0x1dc   : > { %409 = vmax.xlane.f32.xlu1 %v399_v45  ;;  %v440_v47 = vrot.slane %v439_v46, 2  ;;  %v429_v48 = vsel %vm408_vm3, %v399_v45, 0.0 }
 0x1dd   : > { %430 = vst [vmem:[%s1012_s19] sm:$0xff] %v429_v48  ;;  %v446_v49 = vrot.slane %v429_v48, 4 }
 0x1de   : > { %v441_v50 = vadd.f32 %v440_v47, %v439_v46 }
 0x1df   : > { %v447_v51 = vadd.f32 %v446_v49, %v429_v48 }
 0x1e0   : > { %v442_v52 = vrot.slane %v441_v50, 1 }
 0x1e1   : > { %v448_v53 = vrot.slane %v447_v51, 2 }
 0x1e2   : > { %v443_v54 = vadd.f32 %v442_v52, %v441_v50 }
 0x1e3   : > { %v449_v55 = vadd.f32 %v448_v53, %v447_v51 }
 0x1e4   : > { %445 = vst.msk [vmem:[%s284_s29] sm:$0x1] %vm444_vm7, %v443_v54  ;;  %s481_s29 = sshll.u32 %s1012_s19, 4  ;;  %s482_s29 = int_to_ptr.vmem [resolvable:$true] %s481_s29 }
 0x1e5   : > { %v450_v56 = vrot.slane %v449_v55, 1 }
 0x1e7   : > { %v451_v57 = vadd.f32 %v450_v56, %v449_v55 }
 0x1e9   : > { %452 = vst [vmem:[%s1095_s9] sm:$0x1] %v451_v57 }
 0x24f   : > { %v410_v58 = vpop.xlane.xlu1 %409 }
 0x250   : > { %vm411_vm9 = vcmp.ge.f32.partialorder %v399_v45, %v410_v58  ;;  %v434_v59 = vsel %vm408_vm3, %v410_v58, 0.0 }
 0x251   : > { %v412_v60 = vsel %vm411_vm9, %v995_v18, 128  ;;  %435 = vst.msk [vmem:[%s281_s13] sm:$0xff] %vm432_vm8, %v434_v59  ;;  %s754_s13 = sshra.s32 %s484_s11, 4  ;;  %s755_s13 = int_to_ptr.hbm [resolvable:$true] %s754_s13 }
 0x252   : > { %v414_v61 = vshra.s32 %v412_v60, 16  ;;  %v413_v63 = vand.u32 65535, %v412_v60  ;;  %s756_s9 = scalar_lea.hbm %s755_s13, 8  ;;  %p761_p0 = scmp.lt.s32.totalorder %s755_s13, %s1090_s2 }
 0x253   : > { %p757_p11 = scmp.ne.s32.totalorder %s755_s13, %s756_s9  ;;  %p762_p1 = scmp.lt.s32.totalorder %s760_s16, %s756_s9 }
 0x254   : > { %v416_v62 = vcvt.s32.f32 %v414_v61 }
 0x255   : > { %p758_p12 = pnand %p757_p11, %p909_p5  ;;  %p763_p2 = por %p762_p1, %p761_p0 }
 0x256   : > { %417 = vmin.xlane.f32.xlu1 %v416_v62 }
 0x257   : > { %p759_p13 = pneg %p758_p12 }
 0x259   : > { %p764_p3 = pnand %p763_p2, %p759_p13 }
 0x25b   : > { %767 = shalt.err (!%p764_p3)
}
 0x25c   : > { %690 = dma.vmem_to_hbm [thread:$0]  (%p909_p5), %s482_s29, 128, %s484_s11, %s454_s12   ;;  %v415_v1 = vcvt.s32.f32 %v413_v63 }
 0x25d   : > { %s1100_s25 = scalar_lea.vmem [#allocation4], %s1005_s17  ;;  %s505_s15 = sshll.u32 %s501_s26, 4  ;;  %s506_s15 = int_to_ptr.hbm [resolvable:$true] %s505_s15 }
 0x25e   : > { %s503_s19 = sshll.u32 %s1100_s25, 4  ;;  %s470_s0 = scalar_lea.sflag [#allocation5], %s1005_s17  ;;  %s504_s19 = int_to_ptr.vmem [resolvable:$true] %s503_s19 }
 0x25f   : > { %s782_s20 = sshra.s32 %s506_s15, 4  ;;  %s788_s29 = scalar_lea.hbm %s1094_s6, 2  ;;  %s783_s20 = int_to_ptr.hbm [resolvable:$true] %s782_s20 }
 0x260   : > { %s784_s9 = scalar_lea.hbm %s783_s20, 1  ;;  %p789_p9 = scmp.lt.s32.totalorder %s783_s20, %s1094_s6 }
 0x261   : > { %p785_p4 = scmp.ne.s32.totalorder %s783_s20, %s784_s9  ;;  %p790_p10 = scmp.lt.s32.totalorder %s788_s29, %s784_s9 }
 0x263   : > { %p786_p7 = pnand %p785_p4, %p909_p5  ;;  %p791_p11 = por %p790_p10, %p789_p9 }
 0x265   : > { %p787_p8 = pneg %p786_p7 }
 0x267   : > { %p792_p12 = pnand %p791_p11, %p787_p8 }
 0x2c9   : > { %v418_v0 = vpop.xlane.xlu1 %417 }
 0x2ca   : > { %vm419_vm10 = vcmp.eq.f32.partialorder %v416_v62, %v418_v0 }
 0x2cb   : > { %795 = shalt.err (!%p792_p12)
}
 0x2cc   : > { %691 = dma.vmem_to_hbm [thread:$0]  (%p909_p5), %s504_s19, 16, %s506_s15, %s470_s0   ;;  %v420_v2 = vsel %vm419_vm10, %v415_v1, inf  ;;  %v424_v3 = vcvt.f32.s32 %v418_v0 }
 0x2cd   : > { %421 = vmin.xlane.f32.xlu2 %v420_v2  ;;  %s277_s16 = scalar_lea.vmem %s1091_s3, %s983_s10 }
 0x2ce   : > { %v425_v5 = vshll.u32 %v424_v3, 16 }
 0x340   : > { %v422_v4 = vpop.xlane.xlu2 %421 }
 0x341   : > { %v423_v6 = vcvt.f32.s32 %v422_v4 }
 0x343   : > { %v426_v7 = vadd.s32 %v425_v5, %v423_v6 }
 0x345   : > { %v431_v8 = vsel %vm408_vm3, %v426_v7, 128 }
 0x346   : > { %433 = vst.msk [vmem:[%s277_s16] sm:$0xff] %vm432_vm8, %v431_v8 }
 0x347 PF: > { %p701_p5 = scmp.ge.s32.totalorder %s834_s24, 2  ;;  %s517_s7 = sand.u32 1, %s822_s21  }
 0x348   : > { %s518_s14 = scalar_lea.sflag [#allocation3], %s517_s7 }
 0x349   : > { %p695_p13 = pnand %p701_p5, %p913_p6 }
 0x34b   : > { %p696_p0 = pneg %p695_p13 }
 0x34d   : > { %813 = dma.done.wait (%p696_p0), %s518_s14, 128  }
 0x34e   : > { %815 = vsyncadd (%p696_p0), %s518_s14, 4294967168  ;;  %s548_s18 = scalar_lea.sflag [#allocation5], %s517_s7 }
 0x34f   : > { %817 = dma.done.wait (%p696_p0), %s548_s18, 16  }
 0x350   : > { %819 = vsyncadd (%p696_p0), %s548_s18, 4294967280  ;;  %p20_p1 = scmp.ge.s32.totalorder %s896_s27, 4   ;;  %s1101_s21 = smov %s826_s22 }
 0x351   : > { %s1102_s22 = smov %s830_s23  ;;  %s1103_s23 = smov %s907_s30 }
 0x352   : > { %s1104_s24 = smov %s896_s27  ;;  %22 = sbr.rel (!%p20_p1) target bundleno = 7 (0x7), region = 116 }
 0x357   :  { %553 = vsyncpa [#allocation3], 1 }
 0x358   :  { %555 = vsyncpa [#allocation3 + $0x1], 1 }
 0x359   :  { %556 = vsyncpa [#allocation5], 1 }
 0x35a   :  { %558 = vsyncpa [#allocation5 + $0x1], 1 }

</bundles_post_ra>
